<compile_context>
chip_gen: v5e
topology: v5e:2x2
jax: 0.10.0
libtpu: 0.0.40
codegen_flags: <defaults>
</compile_context>

<pallas_src>
import math

import jax
import jax.numpy as jnp
from jax.experimental import pallas as pl
from jax.experimental.pallas import tpu as pltpu

_MIB = 1024 * 1024


def _pe_add_kernel(x_ref, enc_ref, o_ref):
    # x_ref/o_ref: (TB, W) tile; enc_ref: (1, W), same block every step
    # (VMEM-resident).  Single broadcasting add -> DMA is the binding resource.
    o_ref[...] = x_ref[...] + enc_ref[...]


def make_positional_encoding(state_embedding_size: int, max_seq_length: int) -> jnp.ndarray:
    """Deterministic sinusoidal table, identical to the PyTorch __init__ (even d)."""
    d = state_embedding_size
    position = jnp.arange(0, max_seq_length, dtype=jnp.float32)[:, None]          # (L, 1)
    div_term = jnp.exp(jnp.arange(0, d, 2, dtype=jnp.float32)
                       * (-(math.log(10000.0) / d)))                              # (ceil(d/2),)
    enc = jnp.zeros((max_seq_length, d), dtype=jnp.float32)
    enc = enc.at[:, 0::2].set(jnp.sin(position * div_term))
    enc = enc.at[:, 1::2].set(jnp.cos(position * div_term)[:, : d // 2])
    return enc


def _round_up(n: int, m: int) -> int:
    return -(-n // m) * m


def _is_v7x() -> bool:
    try:
        kind = jax.devices()[0].device_kind.lower()
    except Exception:
        return False
    return ("v7" in kind) or ("7x" in kind)


def positional_encoding_forward(x: jnp.ndarray, encoding: jnp.ndarray, *,
                                use_pallas=None,
                                _target_block_bytes=None,
                                _max_rows_per_block=None) -> jnp.ndarray:
    """x: (*initial_dims, num_agents, embed_size); encoding: (max_seq_len, embed_size)."""
    *initial_dims, num_agents, embed_size = x.shape
    max_seq_length, enc_embed = encoding.shape
    if num_agents > max_seq_length:
        raise ValueError(
            f"num_agents ({num_agents}) exceeds max_seq_length ({max_seq_length})")
    if enc_embed != embed_size:
        raise ValueError(
            f"embed_size mismatch: x has {embed_size}, encoding has {enc_embed}")

    enc = encoding[:num_agents, :].astype(x.dtype)                                 # (A, E)

    batch = 1
    for d in initial_dims:
        batch *= d

    itemsize = jnp.dtype(x.dtype).itemsize
    total_bytes = batch * num_agents * embed_size * itemsize

    # --- Tiny-tensor bypass: fused XLA add wins below a few hundred KiB. ----
    if use_pallas is None:
        use_pallas = total_bytes >= 256 * 1024
    if (not use_pallas) or batch == 0 or num_agents == 0 or embed_size == 0:
        return x + jnp.broadcast_to(enc, x.shape)

    # --- Lane-dense flattening: (B, A*E). -----------------------------------
    row = num_agents * embed_size
    row_bytes = row * itemsize
    x_flat = x.reshape(batch, row)
    enc_row = enc.reshape(1, row)

    is_v7 = _is_v7x()
    target_block_bytes = _target_block_bytes
    if target_block_bytes is None:
        target_block_bytes = 5 * _MIB if is_v7 else 2 * _MIB

    # Packed sublane tile per dtype: f32 -> 8, bf16/f16 -> 16, int8/fp8 -> 32.
    sub = max(8, 32 // itemsize)

    if sub * row_bytes > target_block_bytes:
        # ---- Wide-row guard: tile the lane axis too (128-lane multiples) so
        # the double-buffered in+out footprint stays inside the VMEM budget.
        row_tile = max(128, (target_block_bytes // (sub * itemsize)) // 128 * 128)
        row_tile = min(row_tile, row)                       # full extent always legal
        tb = batch if batch < sub else sub
        grid = (pl.cdiv(batch, tb), pl.cdiv(row, row_tile))
        in_specs = [
            pl.BlockSpec((tb, row_tile), lambda b, r: (b, r)),
            pl.BlockSpec((1, row_tile), lambda b, r: (0, r)),
        ]
        out_specs = pl.BlockSpec((tb, row_tile), lambda b, r: (b, r))
        dims = ("parallel", "parallel")
        block_bytes = tb * row_tile * itemsize
    else:
        # ---- Batch-tiled path: biggest block that fits the budget.
        tb = max(sub, (target_block_bytes // row_bytes) // sub * sub)
        if _max_rows_per_block is not None:                 # test hook (partial blocks)
            tb = max(sub, min(tb, _round_up(_max_rows_per_block, sub)))
        if tb >= batch:
            tb = batch                                      # single full-extent block
            if is_v7:
                # v7x has 2 TensorCores: split into 2 steps only if each block
                # stays >= ~1 MiB so the 2-core win beats per-step overhead.
                half = _round_up(pl.cdiv(batch, 2), sub)
                if 0 < half < batch and half * row_bytes >= _MIB:
                    tb = half
        elif is_v7:
            # Keep the grid length even on v7x so both cores get equal work,
            # but never shrink blocks below ~1 MiB to do it.
            steps = pl.cdiv(batch, tb)
            if steps % 2 == 1:
                new_tb = _round_up(pl.cdiv(batch, steps + 1), sub)
                if 0 < new_tb < tb and new_tb * row_bytes >= _MIB:
                    tb = new_tb
        grid = (pl.cdiv(batch, tb),)
        in_specs = [
            pl.BlockSpec((tb, row), lambda b: (b, 0)),
            pl.BlockSpec((1, row), lambda b: (0, 0)),       # VMEM-resident table
        ]
        out_specs = pl.BlockSpec((tb, row), lambda b: (b, 0))
        dims = ("parallel",)
        block_bytes = tb * row * itemsize

    # Double-buffered in + out (~4x block) + encoding + slack; cap at 48 MiB so
    # we stay comfortably inside v7x's 64 MiB physical VMEM.
    vmem_limit = int(min(48 * _MIB, max(32 * _MIB, 5 * block_bytes + row_bytes)))

    out = pl.pallas_call(
        _pe_add_kernel,
        out_shape=jax.ShapeDtypeStruct((batch, row), x.dtype),
        grid_spec=pl.GridSpec(
            grid=grid,
            in_specs=in_specs,
            out_specs=out_specs,
        ),
        compiler_params=pltpu.CompilerParams(
            dimension_semantics=dims,
            vmem_limit_bytes=vmem_limit,
        ),
    )(x_flat, enc_row)

    return out.reshape(*initial_dims, num_agents, embed_size)


if __name__ == "__main__":
    # Shapes consistent with the module's forward:
    #   batch = 2, num_agents = 8, state_embedding_size = 32, max_seq_length = 16
    key = jax.random.PRNGKey(0)
    batch, num_agents, embed_size, max_seq_length = 2, 8, 32, 16

    encoding = make_positional_encoding(embed_size, max_seq_length)

    def ref(x):
        return x + jnp.broadcast_to(encoding[: x.shape[-2], :].astype(x.dtype), x.shape)

    # Case 1: tiny MA-POCA shape -> auto path takes the fused-XLA bypass.
    x1 = jax.random.normal(key, (batch, num_agents, embed_size), dtype=jnp.float32)
    y1 = positional_encoding_forward(x1, encoding)
    jax.block_until_ready(y1)
    assert y1.shape == x1.shape
    assert jnp.allclose(y1, ref(x1), atol=1e-6), "mismatch (case 1: bypass)"

    # Case 2: same tiny shape but force the Pallas path (single full block).
    y2 = positional_encoding_forward(x1, encoding, use_pallas=True)
    jax.block_until_ready(y2)
    assert jnp.allclose(y2, ref(x1), atol=1e-6), "mismatch (case 2: pallas, full block)"

    # Case 3: multiple leading dims + partial last batch block (20 rows, tb=16).
    x3 = jax.random.normal(jax.random.PRNGKey(1), (5, 4, num_agents, embed_size),
                           dtype=jnp.float32)
    y3 = positional_encoding_forward(x3, encoding, use_pallas=True, _max_rows_per_block=16)
    jax.block_until_ready(y3)
    assert y3.shape == x3.shape
    assert jnp.allclose(y3, ref(x3), atol=1e-6), "mismatch (case 3: partial edge block)"

    # Case 4: forced tiny block budget exercises the wide-row lane-tiling guard.
    x4 = jax.random.normal(jax.random.PRNGKey(2), (16, num_agents, embed_size),
                           dtype=jnp.float32)
    y4 = positional_encoding_forward(x4, encoding, use_pallas=True, _target_block_bytes=4096)
    jax.block_until_ready(y4)
    assert jnp.allclose(y4, ref(x4), atol=1e-6), "mismatch (case 4: lane-tiled path)"

    # Case 5: bf16 input (exercises the 16-row packed sublane tile).
    x5 = jax.random.normal(jax.random.PRNGKey(3), (4, num_agents, embed_size),
                           dtype=jnp.bfloat16)
    y5 = positional_encoding_forward(x5, encoding, use_pallas=True)
    jax.block_until_ready(y5)
    assert jnp.allclose(y5.astype(jnp.float32), ref(x5).astype(jnp.float32),
                        atol=1e-2), "mismatch (case 5: bf16)"

    print("KERNEL_OK")
</pallas_src>

<mosaic_0001>
module attributes {stable_mosaic.version = 11 : i64} {
  func.func @_pe_add_kernel(%arg0: i32, %arg1: memref<2x256xf32, #tpu.memory_space<vmem>>, %arg2: memref<1x256xf32, #tpu.memory_space<vmem>>, %arg3: memref<2x256xf32, #tpu.memory_space<vmem>>) attributes {dimension_semantics = [#tpu.dimension_semantics<parallel>], iteration_bounds = array<i64: 1>, scalar_prefetch = 0 : i64, scratch_operands = 0 : i64, tpu.core_type = #tpu.core_type<tc>, window_params = [{transform_indices = @transform_0, window_bounds = array<i64: 2, 256>}, {pipeline_mode = #tpu.pipeline_mode<synchronous>, transform_indices = @transform_1, window_bounds = array<i64: 1, 256>}, {transform_indices = @transform_2, window_bounds = array<i64: 2, 256>}]} {
    %c0 = arith.constant 0 : index
    %c0_0 = arith.constant 0 : index
    %0 = vector.load %arg1[%c0, %c0_0] : memref<2x256xf32, #tpu.memory_space<vmem>>, vector<2x256xf32>
    %c0_1 = arith.constant 0 : index
    %c0_2 = arith.constant 0 : index
    %1 = vector.load %arg2[%c0_1, %c0_2] : memref<1x256xf32, #tpu.memory_space<vmem>>, vector<1x256xf32>
    %2 = vector.broadcast %1 : vector<1x256xf32> to vector<2x256xf32>
    %3 = arith.addf %0, %2 : vector<2x256xf32>
    %c0_3 = arith.constant 0 : index
    %c0_4 = arith.constant 0 : index
    %4 = vector.load %arg3[%c0_3, %c0_4] : memref<2x256xf32, #tpu.memory_space<vmem>>, vector<2x256xf32>
    tpu.vector_store %arg3[%c0_3, %c0_4], %3 {strides = array<i32>} : memref<2x256xf32, #tpu.memory_space<vmem>>, vector<2x256xf32>,
    return
  }
  func.func @transform_0(%arg0: i32) -> (i32, i32) {
    %c0_i32 = arith.constant 0 : i32
    %c0_i32_0 = arith.constant 0 : i32
    return %arg0, %c0_i32 : i32, i32
  }
  func.func @transform_1(%arg0: i32) -> (i32, i32) {
    %c0_i32 = arith.constant 0 : i32
    %c0_i32_0 = arith.constant 0 : i32
    %c0_i32_1 = arith.constant 0 : i32
    return %c0_i32, %c0_i32_0 : i32, i32
  }
  func.func @transform_2(%arg0: i32) -> (i32, i32) {
    %c0_i32 = arith.constant 0 : i32
    %c0_i32_0 = arith.constant 0 : i32
    return %arg0, %c0_i32 : i32, i32
  }
}

</mosaic_0001>

<bundles_post_ra>
// kernel: tpu_custom_call.1
= control target key start
LH: loop header
LB: loop body
LE: loop exit
PB: predicated region body
PF: predicated region fallthrough
CT: control target
= control target key end

     0   :  { %7 = vsyncpa [#allocation3], 0  ;;  %s177_s0 = inlined_call_operand.hbm [shape: f32[2,256], index: 0, kind: input, shape index: {}]   ;;  %s178_s1 = inlined_call_operand.hbm [shape: f32[1,256], index: 1, kind: input, shape index: {}]   ;;  %s179_s2 = inlined_call_operand.hbm [shape: f32[2,256], index: 2, kind: output, shape index: {}]  }
   0x1   :  { %8 = vsyncpa [#allocation6], 0 }
   0x2   :  { %9 = vsyncpa [#allocation4], 0  ;;  %s15_s11 = sshll.u32 %s177_s0, 4  ;;  %s150_s12 = smov [#allocation2]   ;;  %s16_s11 = int_to_ptr.hbm [resolvable:$true] %s15_s11 }
   0x3   :  { %s17_s13 = sshll.u32 %s150_s12, 4  ;;  %s26_s16 = sshll.u32 %s178_s1, 4  ;;  %s18_s13 = int_to_ptr.vmem [resolvable:$true] %s17_s13  ;;  %s27_s16 = int_to_ptr.hbm [resolvable:$true] %s26_s16 }
   0x4   :  { %20 = dma.hbm_to_vmem [thread:$0]  %s16_s11, 64, %s18_s13, [#allocation3]  }
   0x5   :  { %s151_s17 = smov [#allocation5]  }
   0x6   :  { %s28_s18 = sshll.u32 %s151_s17, 4  ;;  %s29_s18 = int_to_ptr.vmem [resolvable:$true] %s28_s18 }
   0x7   :  { %31 = dma.hbm_to_vmem [thread:$0]  %s27_s16, 32, %s29_s18, [#allocation6]  }
   0x8   :  { %144 = dma.done.wait [#allocation3], 64  }
   0x9   :  { %145 = vsyncadd [#allocation3], 4294967232 }
   0xa   :  { %146 = dma.done.wait [#allocation6], 32  }
   0xb   :  { %147 = vsyncadd [#allocation6], 4294967264  ;;  %v41_v0 = vld [vmem:[#allocation5] sm:$0x3]  ;;  %vm46_vm0 = vcmask 1041408   ;;  %s152_s0 = smov [#allocation7]  }
   0xc   :  { %v43_v1 = vperm.slane %v41_v0, 0  ;;  %v44_v2 = vperm.slane %v41_v0, 1  ;;  %v40_v3 = vld [vmem:[#allocation2] sm:$0xf]  ;;  %s56_s19 = sshll.u32 %s152_s0, 4  ;;  %s58_s21 = sshll.u32 %s179_s2, 4  ;;  %s57_s19 = int_to_ptr.vmem [resolvable:$true] %s56_s19  ;;  %s59_s21 = int_to_ptr.hbm [resolvable:$true] %s58_s21 }
   0xe   :  { %v45_v4 = vrot.slane %v44_v2, 6 }
  0x10   :  { %v47_v5 = vsel %vm46_vm0, %v43_v1, %v45_v4 }
  0x11   :  { %v49_v6 = vadd.f32 %v47_v5, %v40_v3 }
  0x13   :  { %50 = vst [vmem:[#allocation7] sm:$0xf] %v49_v6 }
  0x14   :  { %61 = dma.vmem_to_hbm [thread:$0]  %s57_s19, 64, %s59_s21, [#allocation4]  }
  0x15   :  { %148 = dma.done.wait [#allocation4], 64  }
  0x16   :  { %149 = vsyncadd [#allocation4], 4294967232 }
  0x17   :  { %66 = vsyncpa [#allocation3], 1 }
  0x18   :  { %67 = vsyncpa [#allocation6], 1 }
  0x19   :  { %68 = vsyncpa [#allocation4], 1 }

</bundles_post_ra>
